<compile_context>
chip_gen: v7x
topology: tpu7x:2x2x1
jax: 0.10.0
libtpu: 0.0.40
codegen_flags: <defaults>
</compile_context>

<pallas_src>
import functools

import jax
import jax.numpy as jnp
import numpy as np
from jax.experimental import pallas as pl
from jax.experimental.pallas import tpu as pltpu

_EPS = 1e-5
# Fits v7x (64 MiB physical / 32 MiB scoped default) and raises v5e's 16 MiB default.
_VMEM_LIMIT = 32 * 1024 * 1024


def _round_up(v, m):
    return (v + m - 1) // m * m


# --------------------------------- kernels ----------------------------------
def _mm_stats_kernel(x_ref, w_ref, a_ref, c_ref, s_ref, stats_ref, *, apply_pre):
    """s = (relu(x*a + c) if apply_pre else x) @ w, plus per-tile sum / sum-of-squares.

    x_ref : (Tp, Cin_p) f32     w_ref : (Cin_p, Cout_p) bf16
    a/c   : (1, Cin_p)  f32     s_ref : (Tp, Cout_p) f32
    stats : (1, 2, Cout_p) f32  -- row 0 = sum, row 1 = sum of squares
    """
    x = x_ref[...]
    if apply_pre:
        x = jnp.maximum(x * a_ref[...] + c_ref[...], 0.0)
    s = jnp.dot(x.astype(jnp.bfloat16), w_ref[...],
                preferred_element_type=jnp.float32)
    s_ref[...] = s
    stats_ref[0] = jnp.concatenate(
        [jnp.sum(s, axis=0, keepdims=True),
         jnp.sum(s * s, axis=0, keepdims=True)], axis=0)


def _conv3x3_stats_kernel(y_ref, w_ref, a_ref, c_ref, s_ref, stats_ref, *, H, W):
    """bn1-affine + relu, then 3x3 conv (pad=1, stride=1) on ONE image as a single
    K = 9*C matmul over a rolled + masked patch.

    y_ref : (1, H*W, C) f32     w_ref : (9*C, C) bf16  (tap-major rows)
    a/c   : (1, C) f32          s_ref : (1, H*W, C) f32
    stats : (1, 2, C) f32
    """
    HW = H * W
    y = jnp.maximum(y_ref[0] * a_ref[...] + c_ref[...], 0.0)          # (HW, C) f32

    # flattened-pixel row/col indices, reused by all 9 tap masks (cheap VALU filler)
    p = jax.lax.broadcasted_iota(jnp.int32, (HW, 1), 0)
    row = p // W
    col = p - row * W

    parts = []
    for dy in range(3):
        for dx in range(3):
            off = (dy - 1) * W + (dx - 1)
            if off == 0:
                shifted = y
            else:
                # out[p] = y[(p + off) mod HW]; wrap rows are zeroed by the mask.
                shifted = pltpu.roll(y, shift=(-off) % HW, axis=0)
            valid = ((row + (dy - 1) >= 0) & (row + (dy - 1) < H) &
                     (col + (dx - 1) >= 0) & (col + (dx - 1) < W))
            parts.append((shifted * valid.astype(jnp.float32)).astype(jnp.bfloat16))
    patch = jnp.concatenate(parts, axis=1)                            # (HW, 9*C) bf16

    s = jnp.dot(patch, w_ref[...], preferred_element_type=jnp.float32)
    s_ref[0] = s
    stats_ref[0] = jnp.concatenate(
        [jnp.sum(s, axis=0, keepdims=True),
         jnp.sum(s * s, axis=0, keepdims=True)], axis=0)


def _finalize_kernel(s_ref, x_ref, a_ref, c_ref, out_ref):
    """out = relu(bn3(s3) + identity)."""
    out_ref[...] = jnp.maximum(s_ref[...] * a_ref[...] + c_ref[...] + x_ref[...], 0.0)


# --------------------------------- wrapper ----------------------------------
def _affine_from_stats(stats, gamma_p, beta_p, count):
    """(tiles, 2, C) per-tile [sum, sumsq] -> per-channel BN scale/shift (training mode)."""
    tot = jnp.sum(stats, axis=0)                                  # (2, C)
    mean = tot[0] / count
    var = jnp.maximum(tot[1] / count - mean * mean, 0.0)          # biased variance
    a = gamma_p * jax.lax.rsqrt(var + _EPS)
    c = beta_p - mean * a
    return a.reshape(1, -1), c.reshape(1, -1)


def _cparams():
    return pltpu.CompilerParams(dimension_semantics=("parallel",),
                                vmem_limit_bytes=_VMEM_LIMIT)


def bottleneck_forward(x_nchw, params, *, row_tile=1024):
    """x_nchw: (N, Cin, H, W) float32, PyTorch layout. Returns NCHW output."""
    N, Cin, H, W = x_nchw.shape
    w1, w2, w3 = params["w1"], params["w2"], params["w3"]
    width, Cout = w1.shape[0], w3.shape[0]
    assert Cin == Cout, "identity residual requires inplanes == planes*expansion"
    HW, P = H * W, N * H * W
    assert HW % 8 == 0 and P % 8 == 0

    # lane-dense channel padding (multiples of 128)
    Cp = _round_up(Cin, 128)        # padded in/out channels (Cin == Cout)
    Kp = _round_up(width, 128)      # padded bottleneck width

    # row tile for the 1x1 / finalize passes: largest divisor of P <= row_tile, %8==0
    rt = max(8, min(_round_up(row_tile, 8), P))
    while P % rt:
        rt -= 8
    n_row_tiles = P // rt

    f32 = jnp.float32
    # NCHW -> (P, Cp) channels-last with zero-padded channels
    x2d = jnp.transpose(x_nchw, (0, 2, 3, 1)).reshape(P, Cin)
    x2d = jnp.pad(x2d, ((0, 0), (0, Cp - Cin))).astype(f32)

    # conv weights -> matmul layouts, channel-padded, pre-cast to bf16 (halves DMA)
    w1m = jnp.pad(w1[:, :, 0, 0].T,
                  ((0, Cp - Cin), (0, Kp - width))).astype(jnp.bfloat16)   # (Cp, Kp)
    w2m = jnp.pad(jnp.transpose(w2, (2, 3, 1, 0)),                          # (3,3,in,out)
                  ((0, 0), (0, 0), (0, Kp - width), (0, Kp - width)))
    w2m = w2m.reshape(9 * Kp, Kp).astype(jnp.bfloat16)                      # (9*Kp, Kp)
    w3m = jnp.pad(w3[:, :, 0, 0].T,
                  ((0, Kp - width), (0, Cp - Cout))).astype(jnp.bfloat16)   # (Kp, Cp)

    def pad1(v, n):
        return jnp.pad(v.astype(f32), (0, n - v.shape[0]))
    g1, b1 = pad1(params["g1"], Kp), pad1(params["b1"], Kp)
    g2, b2 = pad1(params["g2"], Kp), pad1(params["b2"], Kp)
    g3, b3 = pad1(params["g3"], Cp), pad1(params["b3"], Cp)
    ones_c = jnp.ones((1, Cp), f32)
    zero_c = jnp.zeros((1, Cp), f32)

    # ---- pass 1: conv1 (1x1) + stats of its output -------------------------
    s1, st1 = pl.pallas_call(
        functools.partial(_mm_stats_kernel, apply_pre=False),
        grid=(n_row_tiles,),
        in_specs=[pl.BlockSpec((rt, Cp), lambda i: (i, 0)),
                  pl.BlockSpec((Cp, Kp), lambda i: (0, 0)),
                  pl.BlockSpec((1, Cp), lambda i: (0, 0)),
                  pl.BlockSpec((1, Cp), lambda i: (0, 0))],
        out_specs=[pl.BlockSpec((rt, Kp), lambda i: (i, 0)),
                   pl.BlockSpec((1, 2, Kp), lambda i: (i, 0, 0))],
        out_shape=[jax.ShapeDtypeStruct((P, Kp), f32),
                   jax.ShapeDtypeStruct((n_row_tiles, 2, Kp), f32)],
        compiler_params=_cparams(),
    )(x2d, w1m, ones_c, zero_c)
    a1, c1 = _affine_from_stats(st1, g1, b1, float(P))

    # ---- pass 2: bn1+relu + conv2 (3x3) + stats, one image per grid step ----
    s2, st2 = pl.pallas_call(
        functools.partial(_conv3x3_stats_kernel, H=H, W=W),
        grid=(N,),
        in_specs=[pl.BlockSpec((1, HW, Kp), lambda n: (n, 0, 0)),
                  pl.BlockSpec((9 * Kp, Kp), lambda n: (0, 0)),
                  pl.BlockSpec((1, Kp), lambda n: (0, 0)),
                  pl.BlockSpec((1, Kp), lambda n: (0, 0))],
        out_specs=[pl.BlockSpec((1, HW, Kp), lambda n: (n, 0, 0)),
                   pl.BlockSpec((1, 2, Kp), lambda n: (n, 0, 0))],
        out_shape=[jax.ShapeDtypeStruct((N, HW, Kp), f32),
                   jax.ShapeDtypeStruct((N, 2, Kp), f32)],
        compiler_params=_cparams(),
    )(s1.reshape(N, HW, Kp), w2m, a1, c1)
    a2, c2 = _affine_from_stats(st2, g2, b2, float(P))

    # ---- pass 3: bn2+relu + conv3 (1x1) + stats -----------------------------
    s3, st3 = pl.pallas_call(
        functools.partial(_mm_stats_kernel, apply_pre=True),
        grid=(n_row_tiles,),
        in_specs=[pl.BlockSpec((rt, Kp), lambda i: (i, 0)),
                  pl.BlockSpec((Kp, Cp), lambda i: (0, 0)),
                  pl.BlockSpec((1, Kp), lambda i: (0, 0)),
                  pl.BlockSpec((1, Kp), lambda i: (0, 0))],
        out_specs=[pl.BlockSpec((rt, Cp), lambda i: (i, 0)),
                   pl.BlockSpec((1, 2, Cp), lambda i: (i, 0, 0))],
        out_shape=[jax.ShapeDtypeStruct((P, Cp), f32),
                   jax.ShapeDtypeStruct((n_row_tiles, 2, Cp), f32)],
        compiler_params=_cparams(),
    )(s2.reshape(P, Kp), w3m, a2, c2)
    a3, c3 = _affine_from_stats(st3, g3, b3, float(P))

    # ---- pass 4: bn3 + residual add + relu ----------------------------------
    out2d = pl.pallas_call(
        _finalize_kernel,
        grid=(n_row_tiles,),
        in_specs=[pl.BlockSpec((rt, Cp), lambda i: (i, 0)),
                  pl.BlockSpec((rt, Cp), lambda i: (i, 0)),
                  pl.BlockSpec((1, Cp), lambda i: (0, 0)),
                  pl.BlockSpec((1, Cp), lambda i: (0, 0))],
        out_specs=pl.BlockSpec((rt, Cp), lambda i: (i, 0)),
        out_shape=jax.ShapeDtypeStruct((P, Cp), f32),
        compiler_params=_cparams(),
    )(s3, x2d, a3, c3)

    return jnp.transpose(out2d[:, :Cout].reshape(N, H, W, Cout), (0, 3, 1, 2))


# ---------------- pure-JAX reference (for correctness check) ----------------
def _ref_forward(x, params, cast_dots=False):
    def mc(v):  # match the kernel: matmul operands in bf16, accumulation in f32
        return v.astype(jnp.bfloat16).astype(jnp.float32) if cast_dots else v

    def conv(h, w, pad=0):
        return jax.lax.conv_general_dilated(
            mc(h), mc(w), window_strides=(1, 1), padding=[(pad, pad), (pad, pad)],
            dimension_numbers=("NCHW", "OIHW", "NCHW"),
            precision=jax.lax.Precision.HIGHEST)

    def bn(h, g, b):
        mu = jnp.mean(h, axis=(0, 2, 3), keepdims=True)
        var = jnp.mean((h - mu) ** 2, axis=(0, 2, 3), keepdims=True)
        return ((h - mu) * jax.lax.rsqrt(var + _EPS) * g.reshape(1, -1, 1, 1)
                + b.reshape(1, -1, 1, 1))

    h = jax.nn.relu(bn(conv(x, params["w1"]), params["g1"], params["b1"]))
    h = jax.nn.relu(bn(conv(h, params["w2"], pad=1), params["g2"], params["b2"]))
    h = bn(conv(h, params["w3"]), params["g3"], params["b3"])
    return jax.nn.relu(h + x)


if __name__ == "__main__":
    # Bottleneck(inplanes=16, planes=4): width = 4, out = planes*4 = 16
    N, H, W = 2, 16, 16
    inplanes, planes = 16, 4
    width = planes            # base_width=64, groups=1
    outplanes = planes * 4    # expansion

    key = jax.random.PRNGKey(0)
    ks = jax.random.split(key, 10)
    x = jax.random.normal(ks[0], (N, inplanes, H, W), jnp.float32)

    params = {
        "w1": 0.2 * jax.random.normal(ks[1], (width, inplanes, 1, 1), jnp.float32),
        "w2": 0.2 * jax.random.normal(ks[2], (width, width, 3, 3), jnp.float32),
        "w3": 0.2 * jax.random.normal(ks[3], (outplanes, width, 1, 1), jnp.float32),
        "g1": 1.0 + 0.1 * jax.random.normal(ks[4], (width,), jnp.float32),
        "b1": 0.1 * jax.random.normal(ks[5], (width,), jnp.float32),
        "g2": 1.0 + 0.1 * jax.random.normal(ks[6], (width,), jnp.float32),
        "b2": 0.1 * jax.random.normal(ks[7], (width,), jnp.float32),
        "g3": 1.0 + 0.1 * jax.random.normal(ks[8], (outplanes,), jnp.float32),
        "b3": 0.1 * jax.random.normal(ks[9], (outplanes,), jnp.float32),
    }

    # row_tile=256 so the toy problem (P = 512 rows) still exercises a 2-step grid.
    out = jax.block_until_ready(bottleneck_forward(x, params, row_tile=256))

    # Primary check: reference with bf16-rounded matmul inputs (what the MXU sees).
    ref_bf16 = jax.block_until_ready(_ref_forward(x, params, cast_dots=True))
    np.testing.assert_allclose(np.asarray(out), np.asarray(ref_bf16),
                               rtol=1e-2, atol=1e-2)
    # Sanity check vs the pure-f32 module math (difference = bf16 matmul rounding).
    ref_f32 = jax.block_until_ready(_ref_forward(x, params, cast_dots=False))
    np.testing.assert_allclose(np.asarray(out), np.asarray(ref_f32),
                               rtol=1e-1, atol=1e-1)
    print("KERNEL_OK")
</pallas_src>

<mosaic_0001>
module attributes {stable_mosaic.version = 11 : i64} {
  func.func @_mm_stats_kernel(%arg0: i32, %arg1: memref<256x128xf32, #tpu.memory_space<vmem>>, %arg2: memref<128x128xbf16, #tpu.memory_space<vmem>>, %arg3: memref<1x128xf32, #tpu.memory_space<vmem>>, %arg4: memref<1x128xf32, #tpu.memory_space<vmem>>, %arg5: memref<256x128xf32, #tpu.memory_space<vmem>>, %arg6: memref<1x2x128xf32, #tpu.memory_space<vmem>>) attributes {dimension_semantics = [#tpu.dimension_semantics<parallel>], iteration_bounds = array<i64: 2>, scalar_prefetch = 0 : i64, scratch_operands = 0 : i64, tpu.core_type = #tpu.core_type<tc>, window_params = [{transform_indices = @transform_0, window_bounds = array<i64: 256, 128>}, {pipeline_mode = #tpu.pipeline_mode<synchronous>, transform_indices = @transform_1, window_bounds = array<i64: 128, 128>}, {pipeline_mode = #tpu.pipeline_mode<synchronous>, transform_indices = @transform_2, window_bounds = array<i64: 1, 128>}, {pipeline_mode = #tpu.pipeline_mode<synchronous>, transform_indices = @transform_3, window_bounds = array<i64: 1, 128>}, {transform_indices = @transform_4, window_bounds = array<i64: 256, 128>}, {transform_indices = @transform_5, window_bounds = array<i64: 1, 2, 128>}]} {
    %c0 = arith.constant 0 : index
    %c0_0 = arith.constant 0 : index
    %0 = vector.load %arg1[%c0, %c0_0] : memref<256x128xf32, #tpu.memory_space<vmem>>, vector<256x128xf32>
    %1 = arith.truncf %0 : vector<256x128xf32> to vector<256x128xbf16>
    %c0_1 = arith.constant 0 : index
    %c0_2 = arith.constant 0 : index
    %2 = vector.load %arg2[%c0_1, %c0_2] : memref<128x128xbf16, #tpu.memory_space<vmem>>, vector<128x128xbf16>
    %cst = arith.constant dense<0.000000e+00> : vector<256x128xf32>
    %3 = tpu.matmul %1, %2, %cst {dimension_numbers = #tpu.dot_dimension_numbers<[1], [0], [0], [1], [0, 0, 1, 1], [], []>} : vector<256x128xbf16>, vector<128x128xbf16>, vector<256x128xf32> -> vector<256x128xf32>
    %c0_3 = arith.constant 0 : index
    %c0_4 = arith.constant 0 : index
    %4 = vector.load %arg5[%c0_3, %c0_4] : memref<256x128xf32, #tpu.memory_space<vmem>>, vector<256x128xf32>
    tpu.vector_store %arg5[%c0_3, %c0_4], %3 {strides = array<i32>} : memref<256x128xf32, #tpu.memory_space<vmem>>, vector<256x128xf32>,
    %cst_5 = arith.constant dense<0.000000e+00> : vector<128xf32>
    %5 = vector.multi_reduction <add>, %3, %cst_5 [0] : vector<256x128xf32> to vector<128xf32>
    %6 = vector.shape_cast %5 : vector<128xf32> to vector<1x128xf32>
    %7 = arith.mulf %3, %3 : vector<256x128xf32>
    %cst_6 = arith.constant dense<0.000000e+00> : vector<128xf32>
    %8 = vector.multi_reduction <add>, %7, %cst_6 [0] : vector<256x128xf32> to vector<128xf32>
    %9 = vector.shape_cast %8 : vector<128xf32> to vector<1x128xf32>
    %10 = tpu.concatenate %6, %9 in 0 : vector<1x128xf32>, vector<1x128xf32> -> vector<2x128xf32>
    %c0_7 = arith.constant 0 : index
    %c0_8 = arith.constant 0 : index
    %c0_9 = arith.constant 0 : index
    %11 = vector.load %arg6[%c0_7, %c0_8, %c0_9] : memref<1x2x128xf32, #tpu.memory_space<vmem>>, vector<1x2x128xf32>
    %12 = vector.shape_cast %11 : vector<1x2x128xf32> to vector<2x128xf32>
    %13 = vector.shape_cast %10 : vector<2x128xf32> to vector<1x2x128xf32>
    tpu.vector_store %arg6[%c0_7, %c0_8, %c0_9], %13 {strides = array<i32>} : memref<1x2x128xf32, #tpu.memory_space<vmem>>, vector<1x2x128xf32>,
    return
  }
  func.func @transform_0(%arg0: i32) -> (i32, i32) {
    %c0_i32 = arith.constant 0 : i32
    %c0_i32_0 = arith.constant 0 : i32
    return %arg0, %c0_i32 : i32, i32
  }
  func.func @transform_1(%arg0: i32) -> (i32, i32) {
    %c0_i32 = arith.constant 0 : i32
    %c0_i32_0 = arith.constant 0 : i32
    %c0_i32_1 = arith.constant 0 : i32
    return %c0_i32, %c0_i32_0 : i32, i32
  }
  func.func @transform_2(%arg0: i32) -> (i32, i32) {
    %c0_i32 = arith.constant 0 : i32
    %c0_i32_0 = arith.constant 0 : i32
    %c0_i32_1 = arith.constant 0 : i32
    return %c0_i32, %c0_i32_0 : i32, i32
  }
  func.func @transform_3(%arg0: i32) -> (i32, i32) {
    %c0_i32 = arith.constant 0 : i32
    %c0_i32_0 = arith.constant 0 : i32
    %c0_i32_1 = arith.constant 0 : i32
    return %c0_i32, %c0_i32_0 : i32, i32
  }
  func.func @transform_4(%arg0: i32) -> (i32, i32) {
    %c0_i32 = arith.constant 0 : i32
    %c0_i32_0 = arith.constant 0 : i32
    return %arg0, %c0_i32 : i32, i32
  }
  func.func @transform_5(%arg0: i32) -> (i32, i32, i32) {
    %c0_i32 = arith.constant 0 : i32
    %c0_i32_0 = arith.constant 0 : i32
    %c0_i32_1 = arith.constant 0 : i32
    return %arg0, %c0_i32, %c0_i32_0 : i32, i32, i32
  }
}

</mosaic_0001>

<bundles_post_ra>
// kernel: tpu_custom_call.1
= control target key start
LH: loop header
LB: loop body
LE: loop exit
PB: predicated region body
PF: predicated region fallthrough
CT: control target
= control target key end

     0   :  { %11 = vsyncpa [#allocation3], 0  ;;  %s1629_s0 = inlined_call_operand.hbm [shape: f32[512,128], index: 0, kind: input, shape index: {}]   ;;  %s1630_s1 = inlined_call_operand.hbm [shape: bf16[128,128], index: 1, kind: input, shape index: {}]   ;;  %s1631_s2 = inlined_call_operand.vmem [shape: f32[1,128], index: 2, kind: input, shape index: {}]   ;;  %s1632_s3 = inlined_call_operand.vmem [shape: f32[1,128], index: 3, kind: input, shape index: {}]   ;;  %s1633_s4 = inlined_call_operand.hbm [shape: f32[512,128], index: 4, kind: output, shape index: {0}]   ;;  %s1634_s5 = inlined_call_operand.hbm [shape: f32[2,2,128], index: 5, kind: output, shape index: {1}]  }
   0x1   :  { %13 = vsyncpa [#allocation3 + $0x1], 0 }
   0x2   :  { %14 = vsyncpa [#allocation6], 0 }
   0x3   :  { %15 = vsyncpa [#allocation4], 0 }
   0x4   :  { %17 = vsyncpa [#allocation4 + $0x1], 0 }
   0x5   :  { %18 = vsyncpa [#allocation9], 0 }
   0x6   :  { %20 = vsyncpa [#allocation9 + $0x1], 0  ;;  %s1228_s18 = smov 0   ;;  %s1230_s19 = smov 0  }
   0x7   :  { %s1232_s2 = smov 0   ;;  %s1234_s3 = smov 0  }
   0x8 LB: > { %s1249_s20 = sadd.s32 4294967295, %s1186_s3   ;;  %s833_s21 = sadd.s32 4294967294, %s1186_s3   ;;  %s1186_s3 = sphi %s1234_s3, %s1654_s3   ;;  %s1182_s2 = sphi %s1232_s2, %s1653_s2   ;;  %s1178_s19 = sphi %s1230_s19, %s1652_s19   ;;  %s1174_s18 = sphi %s1228_s18, %s1651_s18  }
   0x9   : > { %p46_p0 = scmp.ne.s32.totalorder %s1178_s19, %s1174_s18  ;;  %p1635_p1 = scmp.eq.s32.totalorder %s1249_s20, 0 }
   0xa   : > { %p139_p3 = scmp.eq.s32.totalorder %s833_s21, 1  ;;  %p834_p5 = scmp.ge.s32.totalorder %s1186_s3, 1 }
   0xb   : > { %p1258_p4 = por %p1635_p1, %p46_p0  ;;  %p172_p7 = scmp.lt.s32.totalorder %s1186_s3, 3 }
   0xc   : > { %p1263_p6 = por %p139_p3, %p46_p0  ;;  %s1188_s25 = smov [#allocation5]  }
   0xd   : > { %s1638_s22 = scalar_select %p1258_p4, 1, 0 }
   0xe   : > { %s1639_s23 = scalar_select %p1263_p6, 1, 0 }
   0xf   : > { %p1268_p8 = pnand %p834_p5, %p172_p7  ;;  %s184_s26 = sshll.u32 %s1188_s25, 4  ;;  %s1272_s26 = int_to_ptr.vmem [resolvable:$true] %s184_s26 }
  0x10   : > { %s1284_s28 = sadd.s32 1, %s1186_s3   ;;  %s33_s29 = sadd.s32 1, %s1182_s2 }
  0x11   : > { %s1640_s24 = scalar_select %p1268_p8, 1, 0 }
  0x12   : > { %p960_p9 = pneg %p1268_p8  ;;  %s30_s30 = ssub.s32 %s1186_s3, %s1284_s28 }
  0x13   : > { %s1026_s8 = scalar_lea.hbm %s1630_s1, 1024 }
  0x14   : > { %p1279_p11 = pnand %p960_p9, %p1635_p1  ;;  %p1027_p12 = scmp.ne.s32.totalorder %s1630_s1, %s1026_s8 }
  0x15   : > { %p1033_p5 = scmp.lt.u32.totalorder %s1026_s8, %s1630_s1 }
  0x16   : > { %p1028_p13 = pneg %p1279_p11 }
  0x18   : > { %p1029_p0 = pnand %p1028_p13, %p1027_p12 }
  0x1a   : > { %p1030_p3 = pneg %p1029_p0 }
  0x1c   : > { %p1035_p7 = pnand %p1033_p5, %p1030_p3 }
  0x1e   : > { %1038 = shalt.err (!%p1035_p7)
}
  0x1f   : > { %s1039_s13 = scalar_lea.vmem %s1272_s26, 1024  ;;  %p1047_p2 = scmp.lt.s32.totalorder %s1272_s26, %s1272_s26 }
  0x20   : > { %p1040_p9 = scmp.ne.s32.totalorder %s1272_s26, %s1039_s13  ;;  %p1048_p6 = scmp.lt.s32.totalorder %s1039_s13, %s1039_s13 }
  0x22   : > { %p1042_p10 = pnand %p1040_p9, %p1028_p13  ;;  %p1049_p4 = por %p1048_p6, %p1047_p2 }
  0x24   : > { %p1043_p1 = pneg %p1042_p10 }
  0x26   : > { %p1050_p8 = pnand %p1049_p4, %p1043_p1 }
  0x28   : > { %1053 = shalt.err (!%p1050_p8)
}
  0x29   : > { %s1189_s14 = smov 64   ;;  %s1190_s15 = smov 4  }
  0x2a   : > { %963 = dma.hbm_to_vmem [thread:$0]  (!%p1279_p11), %s1630_s1, 1024, %s1272_s26, [#allocation6], %s1189_s14, %s1189_s14, %s1190_s15  }
  0x2b   : > { %p31_p2 = scmp.eq.s32.totalorder %s30_s30, 0  ;;  %p40_p1 = scmp.ne.s32.totalorder %s1182_s2, %s1178_s19 }
  0x2c   : > { %p41_p4 = scmp.eq.s32.totalorder %s1186_s3, 0  ;;  %p976_p6 = scmp.lt.s32.totalorder %s1186_s3, 2 }
  0x2d   : > { %s1315_s21 = scalar_select %p31_p2, %s1182_s2, %s33_s29  }
  0x2e   : > { %p42_p8 = por %p41_p4, %p40_p1  ;;  %p1642_p10 = scmp.eq.s32.totalorder %s1249_s20, 1 }
  0x2f   : > { %s204_s6 = sand.u32 1, %s1182_s2   ;;  %s860_s7 = sshll.u32 %s1186_s3, 12 }
  0x30   : > { %p1319_p12 = por %p1642_p10, %p40_p1  ;;  %s837_s8 = sshll.u32 %s204_s6, 8 }
  0x31   : > { %s1328_s10 = scalar_lea.hbm %s1629_s0, %s860_s7  ;;  %s208_s26 = scalar_lea.vmem [#allocation2], %s837_s8 }
  0x32   : > { %s215_s29 = sshll.u32 %s208_s26, 4  ;;  %p1330_p11 = pnand %p976_p6, %p42_p8  ;;  %s1334_s29 = int_to_ptr.vmem [resolvable:$true] %s215_s29 }
  0x33   : > { %s1336_s11 = scalar_lea.sflag [#allocation3], %s204_s6  ;;  %s1054_s12 = scalar_lea.hbm %s1328_s10, 4096 }
  0x34   : > { %p1055_p13 = scmp.ne.s32.totalorder %s1328_s10, %s1054_s12  ;;  %p1056_p0 = pneg %p1330_p11 }
  0x35   : > { %s1059_s15 = scalar_lea.hbm %s1629_s0, 8192  ;;  %p1060_p7 = scmp.lt.u32.totalorder %s1328_s10, %s1629_s0 }
  0x36   : > { %p1057_p3 = pnand %p1056_p0, %p1055_p13  ;;  %p1061_p9 = scmp.lt.u32.totalorder %s1059_s15, %s1054_s12 }
  0x37   : > { %p1063_p1 = scmp.lt.u32.totalorder %s1054_s12, %s1328_s10 }
  0x38   : > { %p1058_p5 = pneg %p1057_p3  ;;  %p1062_p2 = por %p1061_p9, %p1060_p7 }
  0x3a   : > { %p1064_p4 = por %p1063_p1, %p1062_p2 }
  0x3c   : > { %p1065_p6 = pnand %p1064_p4, %p1058_p5 }
  0x3e   : > { %1068 = shalt.err (!%p1065_p6)
}
  0x3f   : > { %s1069_s6 = scalar_lea.vmem %s1334_s29, 4096  ;;  %s1191_s7 = smov [#allocation2]  }
  0x40   : > { %p1070_p8 = scmp.ne.s32.totalorder %s1334_s29, %s1069_s6  ;;  %s1074_s8 = sshll.u32 %s1191_s7, 4  ;;  %s1075_s8 = int_to_ptr.vmem [resolvable:$false] %s1074_s8 }
  0x41   : > { %s1076_s27 = scalar_lea.vmem %s1075_s8, 8192  ;;  %p1077_p3 = scmp.lt.s32.totalorder %s1334_s29, %s1075_s8 }
  0x42   : > { %p1072_p10 = pnand %p1070_p8, %p1056_p0  ;;  %p1078_p7 = scmp.lt.s32.totalorder %s1076_s27, %s1069_s6 }
  0x44   : > { %p1073_p13 = pneg %p1072_p10  ;;  %p1079_p9 = por %p1078_p7, %p1077_p3 }
  0x46   : > { %p1080_p2 = pnand %p1079_p9, %p1073_p13 }
  0x48   : > { %1083 = shalt.err (!%p1080_p2)
}
  0x49   : > { %s1192_s9 = smov 128   ;;  %s1193_s26 = smov 8  }
  0x4a   : > { %967 = dma.hbm_to_vmem [thread:$0]  (!%p1330_p11), %s1328_s10, 4096, %s1334_s29, %s1336_s11, %s1192_s9, %s1192_s9, %s1193_s26  }
  0x4b   : > { %p1645_p0 = scmp.ne.s32.totalorder %s1640_s24, 0 }
  0x4c   : > { %s1367_s12 = sand.u32 (!%p1645_p0), 1, %s1178_s19   ;;  %p1646_p5 = scmp.ne.s32.totalorder (!%p1645_p0), %s1638_s22, 0 }
  0x4d   : > { %227 = sbr.rel (%p1645_p0) target bundleno = 438 (0x1b6), region = 36  ;;  %s841_s13 = sshll.u32 (!%p1645_p0), %s1367_s12, 8 }
  0x4e   : > { %s230_s14 = scalar_lea.sflag (!%p1645_p0), [#allocation3], %s1367_s12  ;;  %s1373_s15 = scalar_lea.vmem (!%p1645_p0), [#allocation2], %s841_s13 }
  0x54   : > { %1157 = dma.done.wait (%p1646_p5), %s230_s14, 4096  }
  0x55   : > { %1159 = vsyncadd (%p1646_p5), %s230_s14, 4294963200  ;;  %p1647_p11 = scmp.eq.s32.totalorder %s1249_s20, 0 }
  0x57   : > { %1161 = dma.done.wait (%p1647_p11), [#allocation6], 1024   ;;  %p1648_p1 = pmov %p1647_p11 }
  0x58   : > { %v1018_v0 = vld [vmem:[#allocation5] sm:$0xff]   ;;  %v1019_v1 = vld [vmem:[#allocation5 + $0x8] sm:$0xff]   ;;  %v1020_v2 = vld [vmem:[#allocation5 + $0x10] sm:$0xff]   ;;  %s1417_s22 = scalar_lea.vmem [#allocation7], %s841_s13  ;;  %s861_s24 = sshll.u32 %s1249_s20, 12 }
  0x59   : > { %1163 = vsyncadd (%p1648_p1), [#allocation6], 4294966272  ;;  %886 = vmatprep.subr.bf16.mxu0 %v1018_v0  ;;  %934 = vmatprep.subr.bf16.mxu1 %v1018_v0  ;;  %v1021_v3 = vld [vmem:[#allocation5 + $0x18] sm:$0xff]   ;;  %v272_v4 = vld [vmem:[%s1373_s15] sm:$0xff]  ;;  %s705_s10 = sshll.u32 %s1417_s22, 4  ;;  %s1492_s11 = scalar_lea.hbm %s1633_s4, %s861_s24  ;;  %s1494_s10 = int_to_ptr.vmem [resolvable:$true] %s705_s10 }
  0x5a   : > { %887 = vmatpush3.bf16.msra.mxu0 %v1018_v0  ;;  %942 = vmatpush3.bf16.msra.mxu1 %v1018_v0  ;;  %v273_v5 = vld [vmem:[%s1373_s15 + $0x8] sm:$0xff]  ;;  %v1022_v7 = vld [vmem:[#allocation5 + $0x20] sm:$0xff]   ;;  %v1024_v12 = vld [vmem:[#allocation5 + $0x30] sm:$0xff]   ;;  %s687_s16 = scalar_lea.sflag [#allocation4], %s1367_s12  ;;  %s1084_s17 = scalar_lea.vmem %s1494_s10, 4096 }
  0x5b   : > { %888 = vmatprep.subr.bf16.mxu0 %v1019_v1  ;;  %935 = vmatprep.subr.bf16.mxu1 %v1019_v1  ;;  %v304_v6 = vpack.c.bf16 %v273_v5, %v272_v4  ;;  %v288_v8 = vld [vmem:[%s1373_s15 + $0x80] sm:$0xff]  ;;  %v289_v9 = vld [vmem:[%s1373_s15 + $0x88] sm:$0xff]  ;;  %v1025_v13 = vld [vmem:[#allocation5 + $0x38] sm:$0xff]   ;;  %p1085_p4 = scmp.ne.s32.totalorder %s1494_s10, %s1084_s17  ;;  %s1194_s6 = smov [#allocation7]  }
  0x5c   : > { %v312_v10 = vpack.c.bf16 %v289_v9, %v288_v8  ;;  %v1023_v11 = vld [vmem:[#allocation5 + $0x28] sm:$0xff]   ;;  %v274_v14 = vld [vmem:[%s1373_s15 + $0x10] sm:$0xff]  ;;  %v275_v15 = vld [vmem:[%s1373_s15 + $0x18] sm:$0xff]  ;;  %s1088_s7 = sshll.u32 %s1194_s6, 4  ;;  %s1089_s7 = int_to_ptr.vmem [resolvable:$false] %s1088_s7 }
  0x5d   : > { %902 = vmatprep.mubr.bf16.mxu0 %v304_v6  ;;  %v276_v16 = vld [vmem:[%s1373_s15 + $0x20] sm:$0xff]  ;;  %v277_v17 = vld [vmem:[%s1373_s15 + $0x28] sm:$0xff]  ;;  %v290_v18 = vld [vmem:[%s1373_s15 + $0x90] sm:$0xff]  ;;  %v305_v22 = vpack.c.bf16 %v275_v15, %v274_v14  ;;  %p1086_p6 = pnand %p1085_p4, %p1319_p12  ;;  %s1090_s8 = scalar_lea.vmem %s1089_s7, 8192 }
  0x5e   : > { %889 = vmatpush3.bf16.msra.mxu0 %v1019_v1  ;;  %943 = vmatpush3.bf16.msra.mxu1 %v1019_v1  ;;  %v291_v19 = vld [vmem:[%s1373_s15 + $0x98] sm:$0xff]  ;;  %v292_v20 = vld [vmem:[%s1373_s15 + $0xa0] sm:$0xff]  ;;  %v293_v21 = vld [vmem:[%s1373_s15 + $0xa8] sm:$0xff]  ;;  %v306_v23 = vpack.c.bf16 %v277_v17, %v276_v16  ;;  %p1091_p10 = scmp.lt.s32.totalorder %s1494_s10, %s1089_s7  ;;  %p1092_p13 = scmp.lt.s32.totalorder %s1090_s8, %s1084_s17 }
  0x5f   : > { %890 = vmatprep.subr.bf16.mxu0 %v1020_v2  ;;  %936 = vmatprep.subr.bf16.mxu1 %v1020_v2  ;;  %v313_v24 = vpack.c.bf16 %v291_v19, %v290_v18  ;;  %v314_v25 = vpack.c.bf16 %v293_v21, %v292_v20  ;;  %v278_v26 = vld [vmem:[%s1373_s15 + $0x30] sm:$0xff]  ;;  %v279_v27 = vld [vmem:[%s1373_s15 + $0x38] sm:$0xff]  ;;  %v280_v28 = vld [vmem:[%s1373_s15 + $0x40] sm:$0xff]  ;;  %p1087_p8 = pneg %p1086_p6 }
  0x60   : > { %918 = vmatprep.mubr.bf16.mxu1 %v312_v10  ;;  %v281_v29 = vld [vmem:[%s1373_s15 + $0x48] sm:$0xff]  ;;  %v294_v30 = vld [vmem:[%s1373_s15 + $0xb0] sm:$0xff]  ;;  %v295_v31 = vld [vmem:[%s1373_s15 + $0xb8] sm:$0xff]  ;;  %v307_v34 = vpack.c.bf16 %v279_v27, %v278_v26  ;;  %p1093_p3 = por %p1092_p13, %p1091_p10 }
  0x61   : > { %v296_v32 = vld [vmem:[%s1373_s15 + $0xc0] sm:$0xff]  ;;  %v297_v33 = vld [vmem:[%s1373_s15 + $0xc8] sm:$0xff]  ;;  %v308_v35 = vpack.c.bf16 %v281_v29, %v280_v28  ;;  %v315_v36 = vpack.c.bf16 %v295_v31, %v294_v30  ;;  %v282_v38 = vld [vmem:[%s1373_s15 + $0x50] sm:$0xff] }
  0x62   : > { %891 = vmatpush3.bf16.msra.mxu0 %v1020_v2  ;;  %944 = vmatpush3.bf16.msra.mxu1 %v1020_v2  ;;  %v316_v37 = vpack.c.bf16 %v297_v33, %v296_v32  ;;  %v283_v39 = vld [vmem:[%s1373_s15 + $0x58] sm:$0xff]  ;;  %v284_v40 = vld [vmem:[%s1373_s15 + $0x60] sm:$0xff]  ;;  %v285_v41 = vld [vmem:[%s1373_s15 + $0x68] sm:$0xff]  ;;  %p1094_p7 = pnand %p1093_p3, %p1087_p8 }
  0x63   : > { %892 = vmatprep.subr.bf16.mxu0 %v1021_v3  ;;  %937 = vmatprep.subr.bf16.mxu1 %v1021_v3  ;;  %v298_v42 = vld [vmem:[%s1373_s15 + $0xd0] sm:$0xff]  ;;  %v299_v43 = vld [vmem:[%s1373_s15 + $0xd8] sm:$0xff]  ;;  %v300_v44 = vld [vmem:[%s1373_s15 + $0xe0] sm:$0xff]  ;;  %v309_v46 = vpack.c.bf16 %v283_v39, %v282_v38  ;;  %v310_v47 = vpack.c.bf16 %v285_v41, %v284_v40 }
  0x64   : > { %v301_v45 = vld [vmem:[%s1373_s15 + $0xe8] sm:$0xff]  ;;  %v317_v48 = vpack.c.bf16 %v299_v43, %v298_v42  ;;  %v286_v50 = vld [vmem:[%s1373_s15 + $0x70] sm:$0xff]  ;;  %v287_v51 = vld [vmem:[%s1373_s15 + $0x78] sm:$0xff] }
  0x65   : > { %v318_v49 = vpack.c.bf16 %v301_v45, %v300_v44  ;;  %v302_v52 = vld [vmem:[%s1373_s15 + $0xf0] sm:$0xff]  ;;  %v303_v53 = vld [vmem:[%s1373_s15 + $0xf8] sm:$0xff]  ;;  %v311_v54 = vpack.c.bf16 %v287_v51, %v286_v50 }
  0x66   : > { %893 = vmatpush3.bf16.msra.mxu0 %v1021_v3  ;;  %945 = vmatpush3.bf16.msra.mxu1 %v1021_v3  ;;  %v319_v55 = vpack.c.bf16 %v303_v53, %v302_v52 }
  0x67   : > { %894 = vmatprep.subr.bf16.mxu0 %v1022_v7  ;;  %938 = vmatprep.subr.bf16.mxu1 %v1022_v7 }
  0x6a   : > { %895 = vmatpush3.bf16.msra.mxu0 %v1022_v7  ;;  %946 = vmatpush3.bf16.msra.mxu1 %v1022_v7 }
  0x6b   : > { %896 = vmatprep.subr.bf16.mxu0 %v1023_v11  ;;  %939 = vmatprep.subr.bf16.mxu1 %v1023_v11 }
  0x6e   : > { %897 = vmatpush3.bf16.msra.mxu0 %v1023_v11  ;;  %947 = vmatpush3.bf16.msra.mxu1 %v1023_v11 }
  0x6f   : > { %898 = vmatprep.subr.bf16.mxu0 %v1024_v12  ;;  %940 = vmatprep.subr.bf16.mxu1 %v1024_v12 }
  0x72   : > { %899 = vmatpush3.bf16.msra.mxu0 %v1024_v12  ;;  %948 = vmatpush3.bf16.msra.mxu1 %v1024_v12 }
  0x73   : > { %900 = vmatprep.subr.bf16.mxu0 %v1025_v13  ;;  %941 = vmatprep.subr.bf16.mxu1 %v1025_v13 }
  0x76   : > { %901 = vmatpush3.bf16.msra.mxu0 %v1025_v13  ;;  %949 = vmatpush3.bf16.msra.mxu1 %v1025_v13 }
  0x79   : > { %903 = vmatmul.mubr.bf16.vlgmr.msra.gmra.mrb[0].mxu0 %v305_v22  ;;  %919 = vmatmul.mubr.bf16.vlgmr.msra.gmra.mrb[0].mxu1 %v313_v24 }
  0x7a   : > { %906 = vmatprep.mubr.bf16.mxu0 %v306_v23  ;;  %922 = vmatprep.mubr.bf16.mxu1 %v314_v25 }
  0x81   : > { %907 = vmatmul.mubr.bf16.gmra.mrb[4].mxu0 %v307_v34  ;;  %923 = vmatmul.mubr.bf16.gmra.mrb[4].mxu1 %v315_v36 }
  0x82   : > { %910 = vmatprep.mubr.bf16.mxu0 %v308_v35  ;;  %926 = vmatprep.mubr.bf16.mxu1 %v316_v37 }
  0x89   : > { %911 = vmatmul.mubr.bf16.gmra.mrb[8].mxu0 %v309_v46  ;;  %927 = vmatmul.mubr.bf16.gmra.mrb[8].mxu1 %v317_v48 }
  0x8a   : > { %914 = vmatprep.mubr.bf16.mxu0 %v310_v47  ;;  %930 = vmatprep.mubr.bf16.mxu1 %v318_v49 }
  0x91   : > { %915 = vmatmul.mubr.bf16.gmra.mrb[12].mxu0 %v311_v54  ;;  %931 = vmatmul.mubr.bf16.gmra.mrb[12].mxu1 %v319_v55 }
 0x14c   : > { %v904_v56 = vpop.f32.mrb[0].mxu0  ;;  %v1420_v58 = vpop.f32.mrb[0].mxu1 }
 0x14d   : > { %547 = vst [vmem:[%s1417_s22 + $0x10] sm:$0xff] %v904_v56  ;;  %v418_v57 = vpop.f32.mrb[1].mxu0  ;;  %563 = vst [vmem:[%s1417_s22 + $0x90] sm:$0xff] %v1420_v58  ;;  %v1425_v60 = vpop.f32.mrb[1].mxu1  ;;  %v616_v3 = vmul.f32 %v904_v56, %v904_v56 }
 0x14e   : > { %545 = vst [vmem:[%s1417_s22] sm:$0xff] %v418_v57  ;;  %v905_v59 = vpop.f32.mrb[2].mxu0  ;;  %561 = vst [vmem:[%s1417_s22 + $0x80] sm:$0xff] %v1425_v60  ;;  %v1430_v62 = vpop.f32.mrb[2].mxu1  ;;  %v614_v63 = vmul.f32 %v418_v57, %v418_v57 }
 0x14f   : > { %548 = vst [vmem:[%s1417_s22 + $0x18] sm:$0xff] %v905_v59  ;;  %v421_v61 = vpop.f32.mrb[3].mxu0  ;;  %564 = vst [vmem:[%s1417_s22 + $0x98] sm:$0xff] %v1430_v62  ;;  %v1435_v2 = vpop.f32.mrb[3].mxu1  ;;  %v617_v6 = vmul.f32 %v905_v59, %v905_v59 }
 0x150   : > { %546 = vst [vmem:[%s1417_s22 + $0x8] sm:$0xff] %v421_v61  ;;  %v577_v0 = vadd.f32 %v421_v61, %v418_v57  ;;  %v615_v1 = vmul.f32 %v421_v61, %v421_v61  ;;  %562 = vst [vmem:[%s1417_s22 + $0x88] sm:$0xff] %v1435_v2 }
 0x152   : > { %v578_v4 = vadd.f32 %v904_v56, %v577_v0  ;;  %v646_v5 = vadd.f32 %v615_v1, %v614_v63 }
 0x154   : > { %v647_v7 = vadd.f32 %v646_v5, %v616_v3  ;;  %v908_v8 = vpop.f32.mrb[4].mxu0  ;;  %v579_v9 = vadd.f32 %v905_v59, %v578_v4  ;;  %v1440_v11 = vpop.f32.mrb[4].mxu1 }
 0x155   : > { %551 = vst [vmem:[%s1417_s22 + $0x30] sm:$0xff] %v908_v8  ;;  %v434_v10 = vpop.f32.mrb[5].mxu0  ;;  %567 = vst [vmem:[%s1417_s22 + $0xb0] sm:$0xff] %v1440_v11  ;;  %v1445_v16 = vpop.f32.mrb[5].mxu1  ;;  %v620_v23 = vmul.f32 %v908_v8, %v908_v8 }
 0x156   : > { %549 = vst [vmem:[%s1417_s22 + $0x20] sm:$0xff] %v434_v10  ;;  %v580_v12 = vadd.f32 %v579_v9, %v434_v10  ;;  %v618_v13 = vmul.f32 %v434_v10, %v434_v10  ;;  %v648_v14 = vadd.f32 %v647_v7, %v617_v6  ;;  %v909_v15 = vpop.f32.mrb[6].mxu0  ;;  %565 = vst [vmem:[%s1417_s22 + $0xa0] sm:$0xff] %v1445_v16  ;;  %v1450_v18 = vpop.f32.mrb[6].mxu1 }
 0x157   : > { %552 = vst [vmem:[%s1417_s22 + $0x38] sm:$0xff] %v909_v15  ;;  %v437_v17 = vpop.f32.mrb[7].mxu0  ;;  %568 = vst [vmem:[%s1417_s22 + $0xb8] sm:$0xff] %v1450_v18  ;;  %v1455_v22 = vpop.f32.mrb[7].mxu1  ;;  %v621_v26 = vmul.f32 %v909_v15, %v909_v15 }
 0x158   : > { %v649_v19 = vadd.f32 %v648_v14, %v618_v13  ;;  %550 = vst [vmem:[%s1417_s22 + $0x28] sm:$0xff] %v437_v17  ;;  %v581_v20 = vadd.f32 %v580_v12, %v437_v17  ;;  %v619_v21 = vmul.f32 %v437_v17, %v437_v17  ;;  %566 = vst [vmem:[%s1417_s22 + $0xa8] sm:$0xff] %v1455_v22 }
 0x15a   : > { %v582_v24 = vadd.f32 %v908_v8, %v581_v20  ;;  %v650_v25 = vadd.f32 %v649_v19, %v619_v21 }
 0x15c   : > { %v651_v27 = vadd.f32 %v650_v25, %v620_v23  ;;  %v912_v28 = vpop.f32.mrb[8].mxu0  ;;  %v583_v29 = vadd.f32 %v909_v15, %v582_v24  ;;  %v1460_v31 = vpop.f32.mrb[8].mxu1 }
 0x15d   : > { %555 = vst [vmem:[%s1417_s22 + $0x50] sm:$0xff] %v912_v28  ;;  %v450_v30 = vpop.f32.mrb[9].mxu0  ;;  %571 = vst [vmem:[%s1417_s22 + $0xd0] sm:$0xff] %v1460_v31  ;;  %v1465_v36 = vpop.f32.mrb[9].mxu1  ;;  %v624_v43 = vmul.f32 %v912_v28, %v912_v28 }
 0x15e   : > { %553 = vst [vmem:[%s1417_s22 + $0x40] sm:$0xff] %v450_v30  ;;  %v584_v32 = vadd.f32 %v583_v29, %v450_v30  ;;  %v622_v33 = vmul.f32 %v450_v30, %v450_v30  ;;  %v652_v34 = vadd.f32 %v651_v27, %v621_v26  ;;  %v913_v35 = vpop.f32.mrb[10].mxu0  ;;  %569 = vst [vmem:[%s1417_s22 + $0xc0] sm:$0xff] %v1465_v36  ;;  %v1470_v38 = vpop.f32.mrb[10].mxu1 }
 0x15f   : > { %556 = vst [vmem:[%s1417_s22 + $0x58] sm:$0xff] %v913_v35  ;;  %v453_v37 = vpop.f32.mrb[11].mxu0  ;;  %572 = vst [vmem:[%s1417_s22 + $0xd8] sm:$0xff] %v1470_v38  ;;  %v1475_v42 = vpop.f32.mrb[11].mxu1  ;;  %v625_v46 = vmul.f32 %v913_v35, %v913_v35 }
 0x160   : > { %v653_v39 = vadd.f32 %v652_v34, %v622_v33  ;;  %554 = vst [vmem:[%s1417_s22 + $0x48] sm:$0xff] %v453_v37  ;;  %v585_v40 = vadd.f32 %v584_v32, %v453_v37  ;;  %v623_v41 = vmul.f32 %v453_v37, %v453_v37  ;;  %570 = vst [vmem:[%s1417_s22 + $0xc8] sm:$0xff] %v1475_v42 }
 0x162   : > { %v586_v44 = vadd.f32 %v912_v28, %v585_v40  ;;  %v654_v45 = vadd.f32 %v653_v39, %v623_v41 }
 0x164   : > { %v655_v47 = vadd.f32 %v654_v45, %v624_v43  ;;  %v916_v48 = vpop.f32.mrb[12].mxu0  ;;  %v587_v49 = vadd.f32 %v913_v35, %v586_v44  ;;  %v1482_v51 = vpop.f32.mrb[12].mxu1 }
 0x165   : > { %559 = vst [vmem:[%s1417_s22 + $0x70] sm:$0xff] %v916_v48  ;;  %v466_v50 = vpop.f32.mrb[13].mxu0  ;;  %575 = vst [vmem:[%s1417_s22 + $0xf0] sm:$0xff] %v1482_v51  ;;  %v1487_v56 = vpop.f32.mrb[13].mxu1  ;;  %v628_v3 = vmul.f32 %v916_v48, %v916_v48 }
 0x166   : > { %557 = vst [vmem:[%s1417_s22 + $0x60] sm:$0xff] %v466_v50  ;;  %v588_v52 = vadd.f32 %v587_v49, %v466_v50  ;;  %v626_v53 = vmul.f32 %v466_v50, %v466_v50  ;;  %v656_v54 = vadd.f32 %v655_v47, %v625_v46  ;;  %v917_v55 = vpop.f32.mrb[14].mxu0  ;;  %573 = vst [vmem:[%s1417_s22 + $0xe0] sm:$0xff] %v1487_v56  ;;  %v1499_v59 = vpop.f32.mrb[14].mxu1 }
 0x167   : > { %560 = vst [vmem:[%s1417_s22 + $0x78] sm:$0xff] %v917_v55  ;;  %v469_v57 = vpop.f32.mrb[15].mxu0  ;;  %576 = vst [vmem:[%s1417_s22 + $0xf8] sm:$0xff] %v1499_v59  ;;  %v1504_v1 = vpop.f32.mrb[15].mxu1 }
 0x168   : > { %v657_v61 = vadd.f32 %v656_v54, %v626_v53  ;;  %558 = vst [vmem:[%s1417_s22 + $0x68] sm:$0xff] %v469_v57  ;;  %v589_v63 = vadd.f32 %v588_v52, %v469_v57  ;;  %v627_v0 = vmul.f32 %v469_v57, %v469_v57  ;;  %574 = vst [vmem:[%s1417_s22 + $0xe8] sm:$0xff] %v1504_v1 }
 0x16a   : > { %v590_v4 = vadd.f32 %v916_v48, %v589_v63  ;;  %v658_v5 = vadd.f32 %v657_v61, %v627_v0 }
 0x16b   : > { %1097 = shalt.err (!%p1094_p7)
}
 0x16c   : > { %s1098_s27 = scalar_lea.hbm %s1492_s11, 4096  ;;  %s1102_s13 = scalar_lea.hbm %s1633_s4, 8192 }
 0x16d   : > { %p1099_p9 = scmp.ne.s32.totalorder %s1492_s11, %s1098_s27  ;;  %p1103_p5 = scmp.lt.u32.totalorder %s1492_s11, %s1633_s4 }
 0x16e   : > { %p1104_p11 = scmp.lt.u32.totalorder %s1102_s13, %s1098_s27  ;;  %p1106_p4 = scmp.lt.u32.totalorder %s1098_s27, %s1492_s11 }
 0x16f   : > { %p1100_p2 = pnand %p1099_p9, %p1319_p12 }
 0x170   : > { %p1105_p1 = por %p1104_p11, %p1103_p5 }
 0x171   : > { %p1101_p0 = pneg %p1100_p2 }
 0x172   : > { %p1107_p6 = por %p1106_p4, %p1105_p1 }
 0x174   : > { %p1108_p8 = pnand %p1107_p6, %p1101_p0 }
 0x176   : > { %1111 = shalt.err (!%p1108_p8)
}
 0x177   : > { %s1195_s22 = smov 128   ;;  %s1196_s24 = smov 8   ;;  %v629_v6 = vmul.f32 %v917_v55, %v917_v55  ;;  %v659_v7 = vadd.f32 %v658_v5, %v628_v3  ;;  %v591_v8 = vadd.f32 %v917_v55, %v590_v4  ;;  %v630_v9 = vmul.f32 %v1425_v60, %v1425_v60 }
 0x178   : > { %956 = dma.vmem_to_hbm [thread:$0]  (%p1319_p12), %s1494_s10, 4096, %s1492_s11, %s687_s16, %s1195_s22, %s1195_s22, %s1196_s24   ;;  %v631_v15 = vmul.f32 %v1435_v2, %v1435_v2  ;;  %v632_v17 = vmul.f32 %v1420_v58, %v1420_v58  ;;  %v633_v21 = vmul.f32 %v1430_v62, %v1430_v62  ;;  %v635_v28 = vmul.f32 %v1455_v22, %v1455_v22 }
 0x179   : > { %v592_v10 = vadd.f32 %v591_v8, %v1425_v60  ;;  %v660_v12 = vadd.f32 %v659_v7, %v629_v6  ;;  %v634_v60 = vmul.f32 %v1445_v16, %v1445_v16  ;;  %v639_v39 = vmul.f32 %v1475_v42, %v1475_v42  ;;  %s844_s10 = sshll.u32 %s1367_s12, 1  ;;  %s857_s29 = sshll.u32 %s1249_s20, 5 }
 0x17a   : > { %v644_v48 = vmul.f32 %v1482_v51, %v1482_v51  ;;  %s268_s30 = scalar_lea.vmem [#allocation8], %s844_s10  ;;  %vm683_vm0 = vcmask 1040384   ;;  %s1585_s6 = scalar_lea.hbm %s1634_s5, %s857_s29 }
 0x17b   : > { %v661_v13 = vadd.f32 %v660_v12, %v630_v9  ;;  %v593_v14 = vadd.f32 %v592_v10, %v1435_v2  ;;  %s721_s11 = sshll.u32 %s268_s30, 4  ;;  %s692_s7 = scalar_lea.sflag [#allocation9], %s1367_s12  ;;  %s1587_s11 = int_to_ptr.vmem [resolvable:$true] %s721_s11 }
 0x17c   : > { %s1112_s8 = scalar_lea.vmem %s1587_s11, 32  ;;  %s1197_s20 = smov [#allocation8]  }
 0x17d   : > { %v594_v19 = vadd.f32 %v1420_v58, %v593_v14  ;;  %v662_v20 = vadd.f32 %v661_v13, %v631_v15  ;;  %v636_v58 = vmul.f32 %v1440_v11, %v1440_v11  ;;  %p1113_p10 = scmp.ne.s32.totalorder %s1587_s11, %s1112_s8  ;;  %s1116_s27 = sshll.u32 %s1197_s20, 4  ;;  %s1117_s27 = int_to_ptr.vmem [resolvable:$false] %s1116_s27 }
 0x17e   : > { %s1118_s9 = scalar_lea.vmem %s1117_s27, 64  ;;  %p1119_p7 = scmp.lt.s32.totalorder %s1587_s11, %s1117_s27 }
 0x17f   : > { %v663_v23 = vadd.f32 %v662_v20, %v632_v17  ;;  %v595_v24 = vadd.f32 %v1430_v62, %v594_v19  ;;  %v637_v62 = vmul.f32 %v1450_v18, %v1450_v18  ;;  %p1114_p13 = pnand %p1113_p10, %p1319_p12  ;;  %p1120_p9 = scmp.lt.s32.totalorder %s1118_s9, %s1112_s8 }
 0x181   : > { %v596_v25 = vadd.f32 %v595_v24, %v1445_v16  ;;  %v664_v26 = vadd.f32 %v663_v23, %v633_v21  ;;  %v638_v16 = vmul.f32 %v1465_v36, %v1465_v36  ;;  %p1115_p3 = pneg %p1114_p13  ;;  %p1121_p2 = por %p1120_p9, %p1119_p7 }
 0x183   : > { %v665_v27 = vadd.f32 %v664_v26, %v634_v60  ;;  %v597_v2 = vadd.f32 %v596_v25, %v1455_v22  ;;  %p1122_p0 = pnand %p1121_p2, %p1115_p3 }
 0x185   : > { %v598_v29 = vadd.f32 %v1440_v11, %v597_v2  ;;  %v666_v30 = vadd.f32 %v665_v27, %v635_v28  ;;  %v640_v11 = vmul.f32 %v1460_v31, %v1460_v31 }
 0x187   : > { %v667_v32 = vadd.f32 %v666_v30, %v636_v58  ;;  %v599_v33 = vadd.f32 %v1450_v18, %v598_v29  ;;  %v641_v18 = vmul.f32 %v1470_v38, %v1470_v38 }
 0x189   : > { %v600_v34 = vadd.f32 %v599_v33, %v1465_v36  ;;  %v668_v35 = vadd.f32 %v667_v32, %v637_v62  ;;  %v642_v36 = vmul.f32 %v1487_v56, %v1487_v56 }
 0x18b   : > { %v669_v37 = vadd.f32 %v668_v35, %v638_v16  ;;  %v601_v22 = vadd.f32 %v600_v34, %v1475_v42 }
 0x18d   : > { %v602_v40 = vadd.f32 %v1460_v31, %v601_v22  ;;  %v670_v41 = vadd.f32 %v669_v37, %v639_v39  ;;  %v643_v31 = vmul.f32 %v1504_v1, %v1504_v1 }
 0x18f   : > { %v671_v43 = vadd.f32 %v670_v41, %v640_v11  ;;  %v603_v44 = vadd.f32 %v1470_v38, %v602_v40  ;;  %v645_v38 = vmul.f32 %v1499_v59, %v1499_v59 }
 0x191   : > { %v604_v45 = vadd.f32 %v603_v44, %v1487_v56  ;;  %v672_v46 = vadd.f32 %v671_v43, %v641_v18 }
 0x193   : > { %v673_v42 = vadd.f32 %v672_v46, %v642_v36  ;;  %v605_v47 = vadd.f32 %v604_v45, %v1504_v1 }
 0x195   : > { %v606_v49 = vadd.f32 %v1482_v51, %v605_v47  ;;  %v674_v50 = vadd.f32 %v673_v42, %v643_v31 }
 0x197   : > { %v607_v52 = vadd.f32 %v1499_v59, %v606_v49  ;;  %v675_v53 = vadd.f32 %v674_v50, %v644_v48 }
 0x199   : > { %v608_v54 = vrot.slane %v607_v52, 4  ;;  %v676_v55 = vadd.f32 %v675_v53, %v645_v38 }
 0x19b   : > { %v609_v56 = vadd.f32 %v608_v54, %v607_v52  ;;  %v677_v57 = vrot.slane %v676_v55, 4 }
 0x19d   : > { %v610_v61 = vrot.slane %v609_v56, 2  ;;  %v678_v63 = vadd.f32 %v677_v57, %v676_v55 }
 0x19f   : > { %v611_v0 = vadd.f32 %v610_v61, %v609_v56  ;;  %v679_v1 = vrot.slane %v678_v63, 2 }
 0x1a1   : > { %v612_v3 = vrot.slane %v611_v0, 1  ;;  %v680_v51 = vadd.f32 %v679_v1, %v678_v63 }
 0x1a3   : > { %v681_v4 = vrot.slane %v680_v51, 1  ;;  %v613_v59 = vadd.f32 %v612_v3, %v611_v0 }
 0x1a5   : > { %v682_v5 = vadd.f32 %v681_v4, %v680_v51 }
 0x1a7   : > { %v684_v6 = vsel %vm683_vm0, %v613_v59, %v682_v5 }
 0x1a8   : > { %685 = vst [vmem:[%s268_s30] sm:$0x3] %v684_v6 }
 0x1a9   : > { %1125 = shalt.err (!%p1122_p0)
}
 0x1aa   : > { %s1126_s12 = scalar_lea.hbm %s1585_s6, 32  ;;  %s1130_s14 = scalar_lea.hbm %s1634_s5, 64 }
 0x1ab   : > { %p1127_p5 = scmp.ne.s32.totalorder %s1585_s6, %s1126_s12  ;;  %p1131_p4 = scmp.lt.u32.totalorder %s1585_s6, %s1634_s5 }
 0x1ac   : > { %p1132_p6 = scmp.lt.u32.totalorder %s1130_s14, %s1126_s12  ;;  %p1134_p10 = scmp.lt.u32.totalorder %s1126_s12, %s1585_s6 }
 0x1ad   : > { %p1128_p11 = pnand %p1127_p5, %p1319_p12 }
 0x1ae   : > { %p1133_p8 = por %p1132_p6, %p1131_p4 }
 0x1af   : > { %p1129_p1 = pneg %p1128_p11 }
 0x1b0   : > { %p1135_p13 = por %p1134_p10, %p1133_p8 }
 0x1b2   : > { %p1136_p3 = pnand %p1135_p13, %p1129_p1 }
 0x1b4   : > { %1139 = shalt.err (!%p1136_p3)
}
 0x1b5   : > { %957 = dma.vmem_to_hbm [thread:$0]  (%p1319_p12), %s1587_s11, 32, %s1585_s6, %s692_s7  }
 0x1b6 PF: > { %s733_s24 = sand.u32 1, %s1174_s18   ;;  %p1649_p7 = scmp.ne.s32.totalorder %s1639_s23, 0 }
 0x1b7   : > { %p1650_p9 = scmp.ge.s32.totalorder %s1186_s3, 2  ;;  %s734_s10 = scalar_lea.sflag [#allocation4], %s733_s24 }
 0x1b9   : > { %p969_p2 = pnand %p1650_p9, %p1649_p7 }
 0x1bb   : > { %1165 = dma.done.wait (!%p969_p2), %s734_s10, 4096  }
 0x1bc   : > { %1167 = vsyncadd (!%p969_p2), %s734_s10, 4294963200  ;;  %s743_s29 = scalar_lea.sflag [#allocation9], %s733_s24 }
 0x1bd   : > { %1169 = dma.done.wait (!%p969_p2), %s743_s29, 32  }
 0x1be   : > { %1171 = vsyncadd (!%p969_p2), %s743_s29, 4294967264  ;;  %p23_p12 = scmp.ge.s32.totalorder %s1284_s28, 4   ;;  %s1651_s18 = smov %s1178_s19 }
 0x1bf   : > { %s1652_s19 = smov %s1182_s2  ;;  %s1653_s2 = smov %s1315_s21 }
 0x1c0   : > { %s1654_s3 = smov %s1284_s28  ;;  %25 = sbr.rel (!%p23_p12) target bundleno = 8 (0x8), region = 102 }
 0x1c7   :  { %748 = vsyncpa [#allocation3], 1 }
 0x1c8   :  { %750 = vsyncpa [#allocation3 + $0x1], 1 }
 0x1c9   :  { %751 = vsyncpa [#allocation6], 1 }
 0x1ca   :  { %752 = vsyncpa [#allocation4], 1 }
 0x1cb   :  { %754 = vsyncpa [#allocation4 + $0x1], 1 }
 0x1cc   :  { %755 = vsyncpa [#allocation9], 1 }
 0x1cd   :  { %757 = vsyncpa [#allocation9 + $0x1], 1 }

</bundles_post_ra>
